<compile_context>
chip_gen: v5e
topology: v5e:2x2
jax: 0.10.0
libtpu: 0.0.40
codegen_flags: <defaults>
</compile_context>

<pallas_src>
import functools

import jax
import jax.numpy as jnp
import numpy as np
from jax import lax
from jax.experimental import pallas as pl
from jax.experimental.pallas import tpu as pltpu


# Fused (table-resident) path is only a win for small vocabularies; beyond
# this the one-hot contraction's MXU flops / VMEM footprint stop paying off.
_FUSED_MAX_ROWS = 1024
# Cap on each (N_pad, TB) one-hot intermediate inside the fused kernel.
_ONEHOT_BUDGET_BYTES = 4 << 20


def _round_up(x, m):
    return (x + m - 1) // m * m


# ---------------------------------------------------------------------------
# Kernels
# ---------------------------------------------------------------------------

def gmf_fused_kernel(uidx_ref, iidx_ref, utab_ref, itab_ref, w_ref, b_ref, out_ref):
    """Fused gather + GMF.  Tables resident in VMEM; gather via one-hot MXU matmul.

    uidx/iidx: (1, TB) int32   utab/itab: (F, N_pad) bf16 (VMEM-resident)
    w: (F, 1) f32   b: (1,) SMEM   out: (1, TB) f32 (lane-dense)
    """
    nu = utab_ref.shape[1]
    ni = itab_ref.shape[1]
    tb = out_ref.shape[1]

    # One-hot selection matrices: row n, lane b is 1 iff idx[b] == n.
    eq_u = lax.broadcasted_iota(jnp.int32, (nu, tb), 0) == uidx_ref[...]
    eq_i = lax.broadcasted_iota(jnp.int32, (ni, tb), 0) == iidx_ref[...]
    onehot_u = jnp.where(eq_u, 1.0, 0.0).astype(utab_ref.dtype)
    onehot_i = jnp.where(eq_i, 1.0, 0.0).astype(itab_ref.dtype)

    # MXU gather: (F, N) @ (N, TB) -> (F, TB), exact (single nonzero per column).
    ue = jnp.dot(utab_ref[...], onehot_u, preferred_element_type=jnp.float32)
    ie = jnp.dot(itab_ref[...], onehot_i, preferred_element_type=jnp.float32)

    weighted = (ue * ie) * w_ref[...]                 # VPU; weight col broadcast on lanes
    # predict_layer: F -> 1 as a sublane reduction (XLU), bias via scalar path.
    out_ref[...] = jnp.sum(weighted, axis=0, keepdims=True) + b_ref[0]


def gmf_stream_kernel(ue_ref, ie_ref, w_ref, b_ref, out_ref):
    """Streaming fallback: pre-gathered bf16 slabs, upcast in-kernel.

    ue/ie: (F, TB) bf16   w: (F, 1) f32   b: (1,) SMEM   out: (1, TB) f32
    """
    prod = ue_ref[...].astype(jnp.float32) * ie_ref[...].astype(jnp.float32)
    weighted = prod * w_ref[...]
    out_ref[...] = jnp.sum(weighted, axis=0, keepdims=True) + b_ref[0]


# ---------------------------------------------------------------------------
# Wrapper
# ---------------------------------------------------------------------------

def gmf_forward(user, item, params, *, tb=16384, fused_max_rows=_FUSED_MAX_ROWS):
    """Fused GMF forward.  user/item: (B,) int32.  Returns (B,) float32."""
    if tb % 128 != 0:
        raise ValueError("batch tile must be a multiple of 128 (lane width)")

    ue_tab = params["embed_user_t"]                   # (F, user_num) bf16
    ie_tab = params["embed_item_t"]                   # (F, item_num) bf16
    f_ = ue_tab.shape[0]
    n_user = ue_tab.shape[1]
    n_item = ie_tab.shape[1]
    b = user.shape[0]

    user = user.astype(jnp.int32)
    item = item.astype(jnp.int32)
    w_col = params["w"].reshape(f_, 1).astype(jnp.float32)   # (F, 1)
    bias = params["b"].reshape(1).astype(jnp.float32)        # (1,) -> SMEM scalar

    b_pad128 = _round_up(b, 128)
    fused = max(n_user, n_item) <= fused_max_rows

    if fused:
        nu_pad = _round_up(n_user, 128)
        ni_pad = _round_up(n_item, 128)
        # Keep each (N_pad, TB) one-hot intermediate within budget.
        onehot_cap = max(128, (_ONEHOT_BUDGET_BYTES // (2 * max(nu_pad, ni_pad))) // 128 * 128)
        tb_eff = min(tb, b_pad128, onehot_cap)
    else:
        tb_eff = min(tb, b_pad128)

    # If a single tile would cover the whole batch, split so grid >= 2
    # (lets v7x shard batch tiles across its 2 TensorCores).
    if tb_eff == b_pad128 and b_pad128 > 128:
        tb_eff = _round_up(b_pad128 // 2, 128)

    b_pad = _round_up(b, tb_eff)
    grid = b_pad // tb_eff

    # Pad only the cheap int32 index vectors (index 0 is always valid).
    if b_pad != b:
        user = jnp.pad(user, (0, b_pad - b))
        item = jnp.pad(item, (0, b_pad - b))

    compiler_params = pltpu.CompilerParams(dimension_semantics=("parallel",))

    if fused:
        utab = ue_tab if nu_pad == n_user else jnp.pad(ue_tab, ((0, 0), (0, nu_pad - n_user)))
        itab = ie_tab if ni_pad == n_item else jnp.pad(ie_tab, ((0, 0), (0, ni_pad - n_item)))
        uidx = user.reshape(1, b_pad)
        iidx = item.reshape(1, b_pad)

        cost = pl.CostEstimate(
            flops=2 * f_ * (nu_pad + ni_pad) * b_pad + 3 * b_pad * f_,
            transcendentals=0,
            bytes_accessed=(f_ * (nu_pad + ni_pad) * 2      # tables read once (bf16)
                            + 2 * b_pad * 4                  # index tiles
                            + b_pad * 4 + f_ * 4 + 4),       # output + weight + bias
        )

        out = pl.pallas_call(
            gmf_fused_kernel,
            out_shape=jax.ShapeDtypeStruct((1, b_pad), jnp.float32),
            grid_spec=pltpu.PrefetchScalarGridSpec(
                num_scalar_prefetch=0,
                grid=(grid,),
                in_specs=[
                    pl.BlockSpec((1, tb_eff), lambda i: (0, i)),        # user index tile
                    pl.BlockSpec((1, tb_eff), lambda i: (0, i)),        # item index tile
                    pl.BlockSpec((f_, nu_pad), lambda i: (0, 0)),       # user table (resident)
                    pl.BlockSpec((f_, ni_pad), lambda i: (0, 0)),       # item table (resident)
                    pl.BlockSpec((f_, 1), lambda i: (0, 0)),            # weight column (resident)
                    pl.BlockSpec(memory_space=pltpu.MemorySpace.SMEM),  # bias scalar
                ],
                out_specs=pl.BlockSpec((1, tb_eff), lambda i: (0, i)),  # lane-dense output
            ),
            compiler_params=compiler_params,
            cost_estimate=cost,
        )(uidx, iidx, utab, itab, w_col, bias)
    else:
        # Streaming fallback (large vocab): external bf16 gather directly into
        # kernel layout (F, B); kernel only streams the slabs.
        ue = jnp.take(ue_tab, user, axis=1)           # (F, b_pad) bf16
        ie = jnp.take(ie_tab, item, axis=1)           # (F, b_pad) bf16

        cost = pl.CostEstimate(
            flops=3 * b_pad * f_,
            transcendentals=0,
            bytes_accessed=2 * b_pad * f_ * 2 + b_pad * 4 + f_ * 4 + 4,
        )

        out = pl.pallas_call(
            gmf_stream_kernel,
            out_shape=jax.ShapeDtypeStruct((1, b_pad), jnp.float32),
            grid_spec=pltpu.PrefetchScalarGridSpec(
                num_scalar_prefetch=0,
                grid=(grid,),
                in_specs=[
                    pl.BlockSpec((f_, tb_eff), lambda i: (0, i),
                                 pipeline_mode=pl.Buffered(3)),          # user slab (bf16)
                    pl.BlockSpec((f_, tb_eff), lambda i: (0, i),
                                 pipeline_mode=pl.Buffered(3)),          # item slab (bf16)
                    pl.BlockSpec((f_, 1), lambda i: (0, 0)),             # weight column
                    pl.BlockSpec(memory_space=pltpu.MemorySpace.SMEM),   # bias scalar
                ],
                out_specs=pl.BlockSpec((1, tb_eff), lambda i: (0, i)),
            ),
            compiler_params=compiler_params,
            cost_estimate=cost,
        )(ue, ie, w_col, bias)

    return out[0, :b]                                 # prediction.view(-1)


def init_params(key, user_num, item_num, factor_num):
    # PyTorch init: nn.init.normal_(std=0.01) for embeddings; nn.Linear default uniform.
    # Tables are stored transposed (F, N) and in bf16 (halves HBM streams); vs. an
    # f32 PyTorch module this introduces only bf16 rounding of 0.01-std values.
    k1, k2, k3, k4 = jax.random.split(key, 4)
    bound = 1.0 / np.sqrt(factor_num)
    return {
        "embed_user_t": (0.01 * jax.random.normal(k1, (factor_num, user_num), jnp.float32)
                         ).astype(jnp.bfloat16),
        "embed_item_t": (0.01 * jax.random.normal(k2, (factor_num, item_num), jnp.float32)
                         ).astype(jnp.bfloat16),
        "w": jax.random.uniform(k3, (1, factor_num), jnp.float32, minval=-bound, maxval=bound),
        "b": jax.random.uniform(k4, (1,), jnp.float32, minval=-bound, maxval=bound),
    }


if __name__ == "__main__":
    user_num, item_num, factor_num = 10, 20, 32
    batch = 6

    key = jax.random.PRNGKey(0)
    pkey, ukey, ikey = jax.random.split(key, 3)
    params = init_params(pkey, user_num, item_num, factor_num)
    user = jax.random.randint(ukey, (batch,), 0, user_num, dtype=jnp.int32)
    item = jax.random.randint(ikey, (batch,), 0, item_num, dtype=jnp.int32)

    # Pure-JAX reference of the same forward pass (Linear(F,1) == sum(x*w)+b),
    # computed in f32 from the same bf16-stored tables.
    ue_ref = params["embed_user_t"].astype(jnp.float32).T[user]   # (B, F)
    ie_ref = params["embed_item_t"].astype(jnp.float32).T[item]   # (B, F)
    ref = jnp.sum((ue_ref * ie_ref) * params["w"], axis=-1) + params["b"][0]

    # Path A: fused in-kernel gather (tables resident in VMEM).
    fused_fn = jax.jit(gmf_forward)
    pred_fused = jax.block_until_ready(fused_fn(user, item, params))
    assert pred_fused.shape == (batch,)
    np.testing.assert_allclose(np.asarray(pred_fused), np.asarray(ref), rtol=1e-5, atol=1e-6)

    # Path B: streaming fallback (forced by disabling the fused threshold).
    stream_fn = jax.jit(functools.partial(gmf_forward, fused_max_rows=0))
    pred_stream = jax.block_until_ready(stream_fn(user, item, params))
    assert pred_stream.shape == (batch,)
    np.testing.assert_allclose(np.asarray(pred_stream), np.asarray(ref), rtol=1e-5, atol=1e-6)

    print("KERNEL_OK")
</pallas_src>

<mosaic_0001>
module attributes {stable_mosaic.version = 11 : i64} {
  func.func @gmf_fused_kernel(%arg0: i32, %arg1: memref<1x128xi32, #tpu.memory_space<vmem>>, %arg2: memref<1x128xi32, #tpu.memory_space<vmem>>, %arg3: memref<32x128xbf16, #tpu.memory_space<vmem>>, %arg4: memref<32x128xbf16, #tpu.memory_space<vmem>>, %arg5: memref<32x1xf32, #tpu.memory_space<vmem>>, %arg6: memref<1xf32, #tpu.memory_space<smem>>, %arg7: memref<1x128xf32, #tpu.memory_space<vmem>>) attributes {dimension_semantics = [#tpu.dimension_semantics<parallel>], iteration_bounds = array<i64: 1>, scalar_prefetch = 0 : i64, scratch_operands = 0 : i64, tpu.core_type = #tpu.core_type<tc>, window_params = [{transform_indices = @transform_0, window_bounds = array<i64: 1, 128>}, {transform_indices = @transform_1, window_bounds = array<i64: 1, 128>}, {pipeline_mode = #tpu.pipeline_mode<synchronous>, transform_indices = @transform_2, window_bounds = array<i64: 32, 128>}, {pipeline_mode = #tpu.pipeline_mode<synchronous>, transform_indices = @transform_3, window_bounds = array<i64: 32, 128>}, {pipeline_mode = #tpu.pipeline_mode<synchronous>, transform_indices = @transform_4, window_bounds = array<i64: 32, 1>}, {transform_indices = @transform_5, window_bounds = array<i64: 1>}, {transform_indices = @transform_6, window_bounds = array<i64: 1, 128>}]} {
    %0 = tpu.iota {dimensions = array<i32: 0>} : vector<128x128xi32>
    %c0 = arith.constant 0 : index
    %c0_0 = arith.constant 0 : index
    %1 = vector.load %arg1[%c0, %c0_0] : memref<1x128xi32, #tpu.memory_space<vmem>>, vector<1x128xi32>
    %2 = vector.broadcast %1 : vector<1x128xi32> to vector<128x128xi32>
    %3 = arith.cmpi eq, %0, %2 : vector<128x128xi32>
    %4 = tpu.iota {dimensions = array<i32: 0>} : vector<128x128xi32>
    %c0_1 = arith.constant 0 : index
    %c0_2 = arith.constant 0 : index
    %5 = vector.load %arg2[%c0_1, %c0_2] : memref<1x128xi32, #tpu.memory_space<vmem>>, vector<1x128xi32>
    %6 = vector.broadcast %5 : vector<1x128xi32> to vector<128x128xi32>
    %7 = arith.cmpi eq, %4, %6 : vector<128x128xi32>
    %cst = arith.constant 1.000000e+00 : f32
    %cst_3 = arith.constant 0.000000e+00 : f32
    %8 = vector.broadcast %cst : f32 to vector<128x128xf32>
    %9 = vector.broadcast %cst_3 : f32 to vector<128x128xf32>
    %10 = arith.select %3, %8, %9 : vector<128x128xi1>, vector<128x128xf32>
    %11 = arith.truncf %10 : vector<128x128xf32> to vector<128x128xbf16>
    %cst_4 = arith.constant 1.000000e+00 : f32
    %cst_5 = arith.constant 0.000000e+00 : f32
    %12 = vector.broadcast %cst_4 : f32 to vector<128x128xf32>
    %13 = vector.broadcast %cst_5 : f32 to vector<128x128xf32>
    %14 = arith.select %7, %12, %13 : vector<128x128xi1>, vector<128x128xf32>
    %15 = arith.truncf %14 : vector<128x128xf32> to vector<128x128xbf16>
    %c0_6 = arith.constant 0 : index
    %c0_7 = arith.constant 0 : index
    %16 = vector.load %arg3[%c0_6, %c0_7] : memref<32x128xbf16, #tpu.memory_space<vmem>>, vector<32x128xbf16>
    %cst_8 = arith.constant dense<0.000000e+00> : vector<32x128xf32>
    %17 = tpu.matmul %16, %11, %cst_8 {dimension_numbers = #tpu.dot_dimension_numbers<[1], [0], [0], [1], [0, 0, 1, 1], [], []>} : vector<32x128xbf16>, vector<128x128xbf16>, vector<32x128xf32> -> vector<32x128xf32>
    %c0_9 = arith.constant 0 : index
    %c0_10 = arith.constant 0 : index
    %18 = vector.load %arg4[%c0_9, %c0_10] : memref<32x128xbf16, #tpu.memory_space<vmem>>, vector<32x128xbf16>
    %cst_11 = arith.constant dense<0.000000e+00> : vector<32x128xf32>
    %19 = tpu.matmul %18, %15, %cst_11 {dimension_numbers = #tpu.dot_dimension_numbers<[1], [0], [0], [1], [0, 0, 1, 1], [], []>} : vector<32x128xbf16>, vector<128x128xbf16>, vector<32x128xf32> -> vector<32x128xf32>
    %20 = arith.mulf %17, %19 : vector<32x128xf32>
    %c0_12 = arith.constant 0 : index
    %c0_13 = arith.constant 0 : index
    %21 = vector.load %arg5[%c0_12, %c0_13] : memref<32x1xf32, #tpu.memory_space<vmem>>, vector<32x1xf32>
    %22 = vector.broadcast %21 : vector<32x1xf32> to vector<32x128xf32>
    %23 = arith.mulf %20, %22 : vector<32x128xf32>
    %cst_14 = arith.constant dense<0.000000e+00> : vector<128xf32>
    %24 = vector.multi_reduction <add>, %23, %cst_14 [0] : vector<32x128xf32> to vector<128xf32>
    %25 = vector.shape_cast %24 : vector<128xf32> to vector<1x128xf32>
    %c0_15 = arith.constant 0 : index
    %26 = memref.load %arg6[%c0_15] : memref<1xf32, #tpu.memory_space<smem>>
    %27 = vector.broadcast %26 : f32 to vector<1x128xf32>
    %28 = arith.addf %25, %27 : vector<1x128xf32>
    %c0_16 = arith.constant 0 : index
    %c0_17 = arith.constant 0 : index
    %29 = vector.load %arg7[%c0_16, %c0_17] : memref<1x128xf32, #tpu.memory_space<vmem>>, vector<1x128xf32>
    tpu.vector_store %arg7[%c0_16, %c0_17], %28 {strides = array<i32>} : memref<1x128xf32, #tpu.memory_space<vmem>>, vector<1x128xf32>,
    return
  }
  func.func @transform_0(%arg0: i32) -> (i32, i32) {
    %c0_i32 = arith.constant 0 : i32
    %c0_i32_0 = arith.constant 0 : i32
    return %c0_i32, %arg0 : i32, i32
  }
  func.func @transform_1(%arg0: i32) -> (i32, i32) {
    %c0_i32 = arith.constant 0 : i32
    %c0_i32_0 = arith.constant 0 : i32
    return %c0_i32, %arg0 : i32, i32
  }
  func.func @transform_2(%arg0: i32) -> (i32, i32) {
    %c0_i32 = arith.constant 0 : i32
    %c0_i32_0 = arith.constant 0 : i32
    %c0_i32_1 = arith.constant 0 : i32
    return %c0_i32, %c0_i32_0 : i32, i32
  }
  func.func @transform_3(%arg0: i32) -> (i32, i32) {
    %c0_i32 = arith.constant 0 : i32
    %c0_i32_0 = arith.constant 0 : i32
    %c0_i32_1 = arith.constant 0 : i32
    return %c0_i32, %c0_i32_0 : i32, i32
  }
  func.func @transform_4(%arg0: i32) -> (i32, i32) {
    %c0_i32 = arith.constant 0 : i32
    %c0_i32_0 = arith.constant 0 : i32
    %c0_i32_1 = arith.constant 0 : i32
    return %c0_i32, %c0_i32_0 : i32, i32
  }
  func.func @transform_5(%arg0: i32) -> i32 {
    %c0_i32 = arith.constant 0 : i32
    %c0_i32_0 = arith.constant 0 : i32
    return %c0_i32 : i32
  }
  func.func @transform_6(%arg0: i32) -> (i32, i32) {
    %c0_i32 = arith.constant 0 : i32
    %c0_i32_0 = arith.constant 0 : i32
    return %c0_i32, %arg0 : i32, i32
  }
}

</mosaic_0001>

<bundles_post_ra>
// kernel: gmf_forward.1
= control target key start
LH: loop header
LB: loop body
LE: loop exit
PB: predicated region body
PF: predicated region fallthrough
CT: control target
= control target key end

     0   :  { %v24_v0 = vlaneseq  ;;  %v318_v10 = vmov 1.0|1.0   ;;  %v319_v16 = vmov 0   ;;  %s478_s0 = inlined_call_operand.vmem [shape: s32[1,128], index: 0, kind: input, shape index: {}]   ;;  %s479_s1 = inlined_call_operand.vmem [shape: s32[1,128], index: 1, kind: input, shape index: {}]   ;;  %s480_s4 = inlined_call_operand.vmem [shape: f32[32,1], index: 4, kind: input, shape index: {}]   ;;  %s481_s2 = inlined_call_operand.vmem [shape: bf16[32,128], index: 2, kind: input, shape index: {}]   ;;  %s482_s3 = inlined_call_operand.vmem [shape: bf16[32,128], index: 3, kind: input, shape index: {}]   ;;  %s483_s5 = inlined_call_operand.<no memory space> [shape: f32[1], index: 5, kind: input, shape index: {}]   ;;  %s484_s6 = inlined_call_operand.vmem [shape: f32[1,128], index: 6, kind: output, shape index: {}]  }
   0x1   :  { %v360_v2 = vld [vmem:[%s478_s0] ss:$0 sm:$0xff]  ;;  %314 = vset.pattern.permute.xlu0 %v319_v16  ;;  %v201_v17 = vld [vmem:[%s480_s4 + $0x10] sm:$0xff]  ;;  %315 = vset.pattern.permute.xlu1 %v319_v16  ;;  %v200_v20 = vld [vmem:[%s480_s4 + $0x8] sm:$0xff]  ;;  %v237_v57 = vstv %s483_s5 }
   0x2   :  { %v355_v1 = vshrl.u32 %v24_v0, 7  ;;  %v365_v3 = vld [vmem:[%s479_s1] ss:$0 sm:$0xff]  ;;  %215 = vperm.xlu1 %315, %v201_v17   ;;  %v202_v23 = vld [vmem:[%s480_s4 + $0x18] sm:$0xff]  ;;  %v293_v26 = vld [vmem:[%s481_s2 + $0x8] sm:$0xff] }
   0x3   :  { %v199_v13 = vld [vmem:[%s480_s4] sm:$0xff]  ;;  %v295_v28 = vld [vmem:[%s482_s3 + $0x8] sm:$0xff] }
   0x4   :  { %v39_v4 = vadd.s32 112, %v355_v1  ;;  %v40_v5 = vadd.s32 120, %v355_v1  ;;  %v37_v6 = vadd.s32 96, %v355_v1  ;;  %v38_v7 = vadd.s32 104, %v355_v1  ;;  %205 = vperm.xlu0 %314, %v199_v13   ;;  %v292_v25 = vld [vmem:[%s481_s2] sm:$0xff] }
   0x5   :  { %v35_v8 = vadd.s32 80, %v355_v1  ;;  %v36_v9 = vadd.s32 88, %v355_v1  ;;  %v33_v11 = vadd.s32 64, %v355_v1  ;;  %v34_v12 = vadd.s32 72, %v355_v1  ;;  %v294_v27 = vld [vmem:[%s482_s3] sm:$0xff] }
   0x6   :  { %vm57_vm0 = vcmp.eq.s32.totalorder %v39_v4, %v360_v2  ;;  %vm58_vm1 = vcmp.eq.s32.totalorder %v40_v5, %v360_v2  ;;  %vm75_vm2 = vcmp.eq.s32.totalorder %v39_v4, %v365_v3  ;;  %vm76_vm3 = vcmp.eq.s32.totalorder %v40_v5, %v365_v3 }
   0x7   :  { %vm252_vm4 = vmpackc.low %vm58_vm1, %vm57_vm0  ;;  %vm55_vm5 = vcmp.eq.s32.totalorder %v37_v6, %v360_v2  ;;  %vm56_vm6 = vcmp.eq.s32.totalorder %v38_v7, %v360_v2  ;;  %vm73_vm7 = vcmp.eq.s32.totalorder %v37_v6, %v365_v3  ;;  %vm74_vm8 = vcmp.eq.s32.totalorder %v38_v7, %v365_v3 }
   0x8   :  { %253 = vmatpush.bf16.msk.msra.mxu0 %vm252_vm4, %v318_v10  ;;  %296 = vmatpush.bf16.msk.msra.mxu2 %vm252_vm4, %v318_v10  ;;  %vm276_vm9 = vmpackc.low %vm76_vm3, %vm75_vm2  ;;  %vm53_vm12 = vcmp.eq.s32.totalorder %v35_v8, %v360_v2  ;;  %vm54_vm13 = vcmp.eq.s32.totalorder %v36_v9, %v360_v2  ;;  %vm71_vm14 = vcmp.eq.s32.totalorder %v35_v8, %v365_v3  ;;  %v31_v14 = vadd.s32 48, %v355_v1 }
   0x9   :  { %277 = vmatpush.bf16.msk.msra.mxu1 %vm276_vm9, %v318_v10  ;;  %304 = vmatpush.bf16.msk.msra.mxu3 %vm276_vm9, %v318_v10  ;;  %vm254_vm10 = vmpackc.low %vm56_vm6, %vm55_vm5  ;;  %vm72_vm15 = vcmp.eq.s32.totalorder %v36_v9, %v365_v3  ;;  %vm51_vm2 = vcmp.eq.s32.totalorder %v33_v11, %v360_v2  ;;  %vm52_vm3 = vcmp.eq.s32.totalorder %v34_v12, %v360_v2  ;;  %v32_v15 = vadd.s32 56, %v355_v1 }
   0xa   :  { %vm278_vm11 = vmpackc.low %vm74_vm8, %vm73_vm7  ;;  %vm69_vm4 = vcmp.eq.s32.totalorder %v33_v11, %v365_v3  ;;  %vm70_vm5 = vcmp.eq.s32.totalorder %v34_v12, %v365_v3  ;;  %vm49_vm8 = vcmp.eq.s32.totalorder %v31_v14, %v360_v2  ;;  %v29_v18 = vadd.s32 32, %v355_v1  ;;  %220 = vperm.xlu1 %315, %v202_v23  }
   0xb   :  { %vm256_vm0 = vmpackc.low %vm54_vm13, %vm53_vm12  ;;  %vm50_vm9 = vcmp.eq.s32.totalorder %v32_v15, %v360_v2  ;;  %v30_v19 = vadd.s32 40, %v355_v1  ;;  %v27_v21 = vadd.s32 16, %v355_v1  ;;  %v28_v22 = vadd.s32 24, %v355_v1 }
   0xc   :  { %255 = vmatpush.bf16.msk.msra.mxu0 %vm254_vm10, %v318_v10  ;;  %297 = vmatpush.bf16.msk.msra.mxu2 %vm254_vm10, %v318_v10  ;;  %vm280_vm1 = vmpackc.low %vm72_vm15, %vm71_vm14  ;;  %vm67_vm10 = vcmp.eq.s32.totalorder %v31_v14, %v365_v3  ;;  %vm47_vm14 = vcmp.eq.s32.totalorder %v29_v18, %v360_v2  ;;  %v26_v24 = vadd.s32 8, %v355_v1 }
   0xd   :  { %279 = vmatpush.bf16.msk.msra.mxu1 %vm278_vm11, %v318_v10  ;;  %305 = vmatpush.bf16.msk.msra.mxu3 %vm278_vm11, %v318_v10  ;;  %vm258_vm6 = vmpackc.low %vm52_vm3, %vm51_vm2  ;;  %vm68_vm11 = vcmp.eq.s32.totalorder %v32_v15, %v365_v3  ;;  %vm48_vm15 = vcmp.eq.s32.totalorder %v30_v19, %v360_v2 }
   0xe   :  { %vm282_vm7 = vmpackc.low %vm70_vm5, %vm69_vm4  ;;  %210 = vperm.xlu0 %314, %v200_v20   ;;  %vm45_vm4 = vcmp.eq.s32.totalorder %v27_v21, %v360_v2  ;;  %vm46_vm5 = vcmp.eq.s32.totalorder %v28_v22, %v360_v2 }
   0xf   :  { %vm260_vm12 = vmpackc.low %vm50_vm9, %vm49_vm8 }
  0x10   :  { %257 = vmatpush.bf16.msk.msra.mxu0 %vm256_vm0, %v318_v10  ;;  %298 = vmatpush.bf16.msk.msra.mxu2 %vm256_vm0, %v318_v10  ;;  %vm284_vm13 = vmpackc.low %vm68_vm11, %vm67_vm10  ;;  %vm65_vm0 = vcmp.eq.s32.totalorder %v29_v18, %v365_v3  ;;  %vm43_vm10 = vcmp.eq.s32.totalorder %v355_v1, %v360_v2  ;;  %vm44_vm11 = vcmp.eq.s32.totalorder %v26_v24, %v360_v2 }
  0x11   :  { %281 = vmatpush.bf16.msk.msra.mxu1 %vm280_vm1, %v318_v10  ;;  %306 = vmatpush.bf16.msk.msra.mxu3 %vm280_vm1, %v318_v10  ;;  %vm66_vm1 = vcmp.eq.s32.totalorder %v30_v19, %v365_v3  ;;  %vm262_vm2 = vmpackc.low %vm48_vm15, %vm47_vm14 }
  0x12   :  { %vm286_vm3 = vmpackc.low %vm66_vm1, %vm65_vm0 }
  0x13   :  { %vm264_vm8 = vmpackc.low %vm46_vm5, %vm45_vm4 }
  0x14   :  { %259 = vmatpush.bf16.msk.msra.mxu0 %vm258_vm6, %v318_v10  ;;  %299 = vmatpush.bf16.msk.msra.mxu2 %vm258_vm6, %v318_v10  ;;  %vm63_vm6 = vcmp.eq.s32.totalorder %v27_v21, %v365_v3  ;;  %vm266_vm14 = vmpackc.low %vm44_vm11, %vm43_vm10 }
  0x15   :  { %283 = vmatpush.bf16.msk.msra.mxu1 %vm282_vm7, %v318_v10  ;;  %307 = vmatpush.bf16.msk.msra.mxu3 %vm282_vm7, %v318_v10  ;;  %vm64_vm7 = vcmp.eq.s32.totalorder %v28_v22, %v365_v3 }
  0x16   :  { %vm288_vm9 = vmpackc.low %vm64_vm7, %vm63_vm6 }
  0x18   :  { %261 = vmatpush.bf16.msk.msra.mxu0 %vm260_vm12, %v318_v10  ;;  %300 = vmatpush.bf16.msk.msra.mxu2 %vm260_vm12, %v318_v10  ;;  %vm61_vm12 = vcmp.eq.s32.totalorder %v355_v1, %v365_v3 }
  0x19   :  { %285 = vmatpush.bf16.msk.msra.mxu1 %vm284_vm13, %v318_v10  ;;  %308 = vmatpush.bf16.msk.msra.mxu3 %vm284_vm13, %v318_v10  ;;  %vm62_vm13 = vcmp.eq.s32.totalorder %v26_v24, %v365_v3 }
  0x1a   :  { %vm290_vm15 = vmpackc.low %vm62_vm13, %vm61_vm12 }
  0x1c   :  { %263 = vmatpush.bf16.msk.msra.mxu0 %vm262_vm2, %v318_v10  ;;  %301 = vmatpush.bf16.msk.msra.mxu2 %vm262_vm2, %v318_v10 }
  0x1d   :  { %287 = vmatpush.bf16.msk.msra.mxu1 %vm286_vm3, %v318_v10  ;;  %309 = vmatpush.bf16.msk.msra.mxu3 %vm286_vm3, %v318_v10 }
  0x20   :  { %265 = vmatpush.bf16.msk.msra.mxu0 %vm264_vm8, %v318_v10  ;;  %302 = vmatpush.bf16.msk.msra.mxu2 %vm264_vm8, %v318_v10 }
  0x21   :  { %289 = vmatpush.bf16.msk.msra.mxu1 %vm288_vm9, %v318_v10  ;;  %310 = vmatpush.bf16.msk.msra.mxu3 %vm288_vm9, %v318_v10 }
  0x24   :  { %267 = vmatpush.bf16.msk.msra.mxu0 %vm266_vm14, %v318_v10  ;;  %303 = vmatpush.bf16.msk.msra.mxu2 %vm266_vm14, %v318_v10 }
  0x25   :  { %291 = vmatpush.bf16.msk.msra.mxu1 %vm290_vm15, %v318_v10  ;;  %311 = vmatpush.bf16.msk.msra.mxu3 %vm290_vm15, %v318_v10 }
  0x27   :  { %149 = vmatmul.bf16.vlgmr.msra.gmra.mxu0 %v292_v25  ;;  %154 = vmatmul.bf16.vlgmr.msra.gmra.mxu2 %v293_v26 }
  0x28   :  { %184 = vmatmul.bf16.vlgmr.msra.gmra.mxu1 %v294_v27  ;;  %189 = vmatmul.bf16.vlgmr.msra.gmra.mxu3 %v295_v28 }
  0x74   :  { %v216_v33 = vpop.permute.xlu1 %215 }
  0x76   :  { %v206_v30 = vpop.permute.xlu0 %205 }
  0x7c   :  { %v221_v48 = vpop.permute.xlu1 %220 }
  0x80   :  { %v211_v39 = vpop.permute.xlu0 %210 }
  0xa4   :  { %v150_v29 = vpop.f32.mrf.mxu0 }
  0xa5   :  { %v185_v31 = vpop.f32.mrf.mxu1 }
  0xa6   :  { %v195_v35 = vmul.f32 %v185_v31, %v150_v29 }
  0xa8   :  { %v223_v40 = vmul.f32 %v206_v30, %v195_v35 }
  0xaa   :  { %v155_v32 = vpop.f32.mrf.mxu2 }
  0xab   :  { %v190_v34 = vpop.f32.mrf.mxu3 }
  0xac   :  { %v152_v36 = vpop.f32.mrf.mxu0  ;;  %v197_v41 = vmul.f32 %v190_v34, %v155_v32 }
  0xad   :  { %v187_v37 = vpop.f32.mrf.mxu1 }
  0xae   :  { %v196_v38 = vmul.f32 %v187_v37, %v152_v36  ;;  %v225_v46 = vmul.f32 %v216_v33, %v197_v41 }
  0xb0   :  { %v224_v42 = vmul.f32 %v211_v39, %v196_v38 }
  0xb2   :  { %v227_v43 = vadd.f32 %v224_v42, %v223_v40  ;;  %v157_v44 = vpop.f32.mrf.mxu2 }
  0xb3   :  { %v192_v45 = vpop.f32.mrf.mxu3 }
  0xb4   :  { %v198_v47 = vmul.f32 %v192_v45, %v157_v44  ;;  %v228_v50 = vadd.f32 %v227_v43, %v225_v46 }
  0xb6   :  { %v226_v49 = vmul.f32 %v221_v48, %v198_v47 }
  0xb8   :  { %v229_v51 = vadd.f32 %v228_v50, %v226_v49 }
  0xba   :  { %v230_v52 = vrot.slane %v229_v51, 4 }
  0xbc   :  { %v231_v53 = vadd.f32 %v230_v52, %v229_v51 }
  0xbe   :  { %v232_v54 = vrot.slane %v231_v53, 2 }
  0xc0   :  { %v233_v55 = vadd.f32 %v232_v54, %v231_v53 }
  0xc2   :  { %v234_v56 = vrot.slane %v233_v55, 1 }
  0xc4   :  { %v235_v58 = vadd.f32 %v234_v56, %v233_v55 }
  0xc6   :  { %v238_v59 = vadd.f32 %v237_v57, %v235_v58 }
  0xc8   :  { %239 = vst [vmem:[%s484_s6] sm:$0x1] %v238_v59 }

</bundles_post_ra>
